<compile_context>
chip_gen: v6e
topology: v6e:2x2x1
jax: 0.10.0
libtpu: 0.0.40
codegen_flags: <defaults>
</compile_context>

<pallas_src>
import functools

import jax
import jax.numpy as jnp
from jax.experimental import pallas as pl
from jax.experimental.pallas import tpu as pltpu


# ----------------------------------------------------------------------------
# Pallas kernel: TB batch elements per grid step, node-major layout
# ----------------------------------------------------------------------------
def _mixprop_kernel(x_ref, at_ref, w_ref, b_ref, o_ref, *,
                    depth, alpha, block_b, c_in, c_out):
    # x_ref : (N, TB*D)        node-major slab, columns grouped (batch, feature)
    # at_ref: (N, N)           A_norm^T (row-normalized adjacency, transposed)
    # w_ref : (K, C)           fuse weight pre-transposed, K = (depth+1)*D
    # b_ref : (1, C)           fuse bias (f32)
    # o_ref : (N, TB*C)        node-major, lane-dense output slab
    D, C, TB = c_in, c_out, block_b

    x = x_ref[...]                       # native dtype -> single-pass MXU for bf16
    at = at_ref[...]
    w = w_ref[...]
    bias = b_ref[...]                    # (1, C) f32

    x32 = x.astype(jnp.float32)
    ax = alpha * x32                     # loop-invariant, hoisted out of hop loop

    # Depth chain is serial, but each dot has a TB*D-wide RHS -> throughput bound.
    h = x
    hops = [h]
    for _ in range(depth):               # short static unroll (depth is small)
        prop = jnp.dot(at, h, preferred_element_type=jnp.float32)   # (N, TB*D) f32
        h32 = ax + (1.0 - alpha) * prop                             # alpha-mix in f32
        h = h32.astype(x.dtype)          # back to native dtype for the next MXU op
        hops.append(h)

    # Fused Linear: hop features stay in vregs (no scratch).  For each batch
    # element gather its D-wide column group from every hop, concatenate to
    # (N, K) and run one MXU matmul; the TB matmuls are independent so they
    # pipeline back to back.
    outs = []
    for b in range(TB):
        ho_b = jnp.concatenate(
            [hh[:, b * D:(b + 1) * D] for hh in hops], axis=-1)      # (N, K)
        o_b = jnp.dot(ho_b, w, preferred_element_type=jnp.float32) + bias
        outs.append(o_b.astype(o_ref.dtype))                         # (N, C)

    o_ref[...] = jnp.concatenate(outs, axis=-1)   # single lane-dense (N, TB*C) store


# ----------------------------------------------------------------------------
# Block-size heuristic
# ----------------------------------------------------------------------------
def _choose_block_b(B, D, C):
    """Pick TB (batch elements per grid step): lane-aligned widths (TB*D, TB*C
    multiples of 128, or full-extent blocks), matmul width >= ~256, and keep
    the grid length >= 2 when possible (two v7x TensorCores)."""
    want = max(1, -(-256 // max(D, 1)))                 # ceil(256 / D)
    divisors = [tb for tb in range(1, B + 1) if B % tb == 0]
    legal = [tb for tb in divisors
             if tb == B or ((tb * D) % 128 == 0 and (tb * C) % 128 == 0)]
    pref = [tb for tb in legal if tb >= want and B // tb >= 2]
    if pref:
        return min(pref)
    return max(legal)                                   # falls back to TB == B


# ----------------------------------------------------------------------------
# Wrapper
# ----------------------------------------------------------------------------
def mixprop_pallas(x, adj, w_fuse, b_fuse, *, depth, alpha):
    """Mixprop forward.
    x: (..., N, D);  adj: (N, N)  (a_ij = edge from i to j);
    w_fuse: (c_out, (depth+1)*D)  [PyTorch nn.Linear layout];  b_fuse: (c_out,)."""
    *lead, N, D = x.shape
    B = 1
    for s in lead:
        B *= s
    B = max(B, 1)
    c_out = w_fuse.shape[0]
    K = (depth + 1) * D

    TB = _choose_block_b(B, D, c_out)
    G = B // TB

    # One-time, batch-independent preprocessing (glue, not activation traffic).
    a = adj + jnp.eye(N, dtype=adj.dtype)
    a = a / jnp.sum(a, axis=1, keepdims=True)
    a_t = a.T.astype(x.dtype)                     # so oneStepProp(h) == a_t @ h
    w_t = w_fuse.T.astype(x.dtype)                # (K, c_out), native MXU dtype
    b2d = b_fuse.reshape(1, c_out).astype(jnp.float32)

    # Layout plumbing: node-major slab so each grid step runs wide matmuls.
    # x: (..., N, D) -> (N, B*D); column group b*D:(b+1)*D is batch element b.
    x_nm = x.reshape(B, N, D).transpose(1, 0, 2).reshape(N, B * D)

    kernel = functools.partial(_mixprop_kernel, depth=depth, alpha=alpha,
                               block_b=TB, c_in=D, c_out=c_out)

    out_nm = pl.pallas_call(
        kernel,
        out_shape=jax.ShapeDtypeStruct((N, B * c_out), x.dtype),
        grid_spec=pltpu.PrefetchScalarGridSpec(
            num_scalar_prefetch=0,
            grid=(G,),
            in_specs=[
                pl.BlockSpec((N, TB * D), lambda g: (0, g)),
                pl.BlockSpec((N, N), lambda g: (0, 0)),
                pl.BlockSpec((K, c_out), lambda g: (0, 0)),
                pl.BlockSpec((1, c_out), lambda g: (0, 0)),
            ],
            out_specs=pl.BlockSpec((N, TB * c_out), lambda g: (0, g)),
        ),
        compiler_params=pltpu.CompilerParams(
            dimension_semantics=("parallel",),
            vmem_limit_bytes=32 * 1024 * 1024,
        ),
    )(x_nm, a_t, w_t, b2d)

    # Back to the module's native layout (cheap: smallest tensor in the problem).
    out = out_nm.reshape(N, B, c_out).transpose(1, 0, 2)
    return out.reshape(*lead, N, c_out)


mixprop_forward = jax.jit(mixprop_pallas, static_argnames=("depth", "alpha"))


# ----------------------------------------------------------------------------
# Reference (plain JAX) for verification
# ----------------------------------------------------------------------------
def reference_forward(x, adj, w_fuse, b_fuse, depth, alpha):
    N = adj.shape[0]
    a = adj + jnp.eye(N, dtype=adj.dtype)
    a = a / jnp.sum(a, axis=1, keepdims=True)
    h = x
    out = [h]
    for _ in range(depth):
        h = alpha * x + (1.0 - alpha) * jnp.einsum('...vd,vw->...wd', h, a)
        out.append(h)
    ho = jnp.concatenate(out, axis=-1)
    return jnp.einsum('...k,ok->...o', ho, w_fuse) + b_fuse


if __name__ == "__main__":
    key = jax.random.PRNGKey(0)
    k_x, k_adj, k_w, k_b = jax.random.split(key, 4)

    batch, seq, N, c_in, c_out = 2, 8, 16, 32, 32   # B = 16 -> TB = 8, grid = (2,)
    depth, alpha = 3, 0.05

    x = jax.random.normal(k_x, (batch, seq, N, c_in), dtype=jnp.float32)
    adj = jax.random.uniform(k_adj, (N, N), dtype=jnp.float32)
    fan_in = (depth + 1) * c_in
    w_fuse = (1.0 / fan_in ** 0.5) * jax.random.normal(
        k_w, (c_out, fan_in), dtype=jnp.float32)
    b_fuse = 0.01 * jax.random.normal(k_b, (c_out,), dtype=jnp.float32)

    out = mixprop_forward(x, adj, w_fuse, b_fuse, depth=depth, alpha=alpha)
    out = jax.block_until_ready(out)

    ref = jax.block_until_ready(
        reference_forward(x, adj, w_fuse, b_fuse, depth, alpha))
    assert out.shape == (batch, seq, N, c_out), out.shape
    max_err = float(jnp.max(jnp.abs(out - ref)))
    assert jnp.allclose(out, ref, atol=1e-4, rtol=1e-4), max_err

    print("KERNEL_OK")
</pallas_src>

<mosaic_0001>
module attributes {stable_mosaic.version = 11 : i64} {
  func.func @_mixprop_kernel(%arg0: i32, %arg1: memref<16x256xf32, #tpu.memory_space<vmem>>, %arg2: memref<16x16xf32, #tpu.memory_space<vmem>>, %arg3: memref<128x32xf32, #tpu.memory_space<vmem>>, %arg4: memref<1x32xf32, #tpu.memory_space<vmem>>, %arg5: memref<16x256xf32, #tpu.memory_space<vmem>>) attributes {dimension_semantics = [#tpu.dimension_semantics<parallel>], iteration_bounds = array<i64: 2>, scalar_prefetch = 0 : i64, scratch_operands = 0 : i64, tpu.core_type = #tpu.core_type<tc>, window_params = [{transform_indices = @transform_0, window_bounds = array<i64: 16, 256>}, {pipeline_mode = #tpu.pipeline_mode<synchronous>, transform_indices = @transform_1, window_bounds = array<i64: 16, 16>}, {pipeline_mode = #tpu.pipeline_mode<synchronous>, transform_indices = @transform_2, window_bounds = array<i64: 128, 32>}, {pipeline_mode = #tpu.pipeline_mode<synchronous>, transform_indices = @transform_3, window_bounds = array<i64: 1, 32>}, {transform_indices = @transform_4, window_bounds = array<i64: 16, 256>}]} {
    %c0 = arith.constant 0 : index
    %c0_0 = arith.constant 0 : index
    %0 = vector.load %arg1[%c0, %c0_0] : memref<16x256xf32, #tpu.memory_space<vmem>>, vector<16x256xf32>
    %c0_1 = arith.constant 0 : index
    %c0_2 = arith.constant 0 : index
    %1 = vector.load %arg2[%c0_1, %c0_2] : memref<16x16xf32, #tpu.memory_space<vmem>>, vector<16x16xf32>
    %c0_3 = arith.constant 0 : index
    %c0_4 = arith.constant 0 : index
    %2 = vector.load %arg3[%c0_3, %c0_4] : memref<128x32xf32, #tpu.memory_space<vmem>>, vector<128x32xf32>
    %c0_5 = arith.constant 0 : index
    %c0_6 = arith.constant 0 : index
    %3 = vector.load %arg4[%c0_5, %c0_6] : memref<1x32xf32, #tpu.memory_space<vmem>>, vector<1x32xf32>
    %cst = arith.constant 5.000000e-02 : f32
    %4 = vector.broadcast %cst : f32 to vector<16x256xf32>
    %5 = arith.mulf %4, %0 : vector<16x256xf32>
    %cst_7 = arith.constant dense<0.000000e+00> : vector<16x256xf32>
    %6 = tpu.matmul %1, %0, %cst_7 {dimension_numbers = #tpu.dot_dimension_numbers<[1], [0], [0], [1], [0, 0, 1, 1], [], []>} : vector<16x16xf32>, vector<16x256xf32>, vector<16x256xf32> -> vector<16x256xf32>
    %cst_8 = arith.constant 0.949999988 : f32
    %7 = vector.broadcast %cst_8 : f32 to vector<16x256xf32>
    %8 = arith.mulf %7, %6 : vector<16x256xf32>
    %9 = arith.addf %5, %8 : vector<16x256xf32>
    %cst_9 = arith.constant dense<0.000000e+00> : vector<16x256xf32>
    %10 = tpu.matmul %1, %9, %cst_9 {dimension_numbers = #tpu.dot_dimension_numbers<[1], [0], [0], [1], [0, 0, 1, 1], [], []>} : vector<16x16xf32>, vector<16x256xf32>, vector<16x256xf32> -> vector<16x256xf32>
    %cst_10 = arith.constant 0.949999988 : f32
    %11 = vector.broadcast %cst_10 : f32 to vector<16x256xf32>
    %12 = arith.mulf %11, %10 : vector<16x256xf32>
    %13 = arith.addf %5, %12 : vector<16x256xf32>
    %cst_11 = arith.constant dense<0.000000e+00> : vector<16x256xf32>
    %14 = tpu.matmul %1, %13, %cst_11 {dimension_numbers = #tpu.dot_dimension_numbers<[1], [0], [0], [1], [0, 0, 1, 1], [], []>} : vector<16x16xf32>, vector<16x256xf32>, vector<16x256xf32> -> vector<16x256xf32>
    %cst_12 = arith.constant 0.949999988 : f32
    %15 = vector.broadcast %cst_12 : f32 to vector<16x256xf32>
    %16 = arith.mulf %15, %14 : vector<16x256xf32>
    %17 = arith.addf %5, %16 : vector<16x256xf32>
    %18 = vector.extract_strided_slice %0 {offsets = [0, 0], sizes = [16, 32], strides = [1, 1]} : vector<16x256xf32> to vector<16x32xf32>
    %19 = vector.extract_strided_slice %9 {offsets = [0, 0], sizes = [16, 32], strides = [1, 1]} : vector<16x256xf32> to vector<16x32xf32>
    %20 = vector.extract_strided_slice %13 {offsets = [0, 0], sizes = [16, 32], strides = [1, 1]} : vector<16x256xf32> to vector<16x32xf32>
    %21 = vector.extract_strided_slice %17 {offsets = [0, 0], sizes = [16, 32], strides = [1, 1]} : vector<16x256xf32> to vector<16x32xf32>
    %22 = tpu.concatenate %18, %19, %20, %21 in 1 : vector<16x32xf32>, vector<16x32xf32>, vector<16x32xf32>, vector<16x32xf32> -> vector<16x128xf32>
    %cst_13 = arith.constant dense<0.000000e+00> : vector<16x32xf32>
    %23 = tpu.matmul %22, %2, %cst_13 {dimension_numbers = #tpu.dot_dimension_numbers<[1], [0], [0], [1], [0, 0, 1, 1], [], []>} : vector<16x128xf32>, vector<128x32xf32>, vector<16x32xf32> -> vector<16x32xf32>
    %24 = vector.broadcast %3 : vector<1x32xf32> to vector<16x32xf32>
    %25 = arith.addf %23, %24 : vector<16x32xf32>
    %26 = vector.extract_strided_slice %0 {offsets = [0, 32], sizes = [16, 32], strides = [1, 1]} : vector<16x256xf32> to vector<16x32xf32>
    %27 = vector.extract_strided_slice %9 {offsets = [0, 32], sizes = [16, 32], strides = [1, 1]} : vector<16x256xf32> to vector<16x32xf32>
    %28 = vector.extract_strided_slice %13 {offsets = [0, 32], sizes = [16, 32], strides = [1, 1]} : vector<16x256xf32> to vector<16x32xf32>
    %29 = vector.extract_strided_slice %17 {offsets = [0, 32], sizes = [16, 32], strides = [1, 1]} : vector<16x256xf32> to vector<16x32xf32>
    %30 = tpu.concatenate %26, %27, %28, %29 in 1 : vector<16x32xf32>, vector<16x32xf32>, vector<16x32xf32>, vector<16x32xf32> -> vector<16x128xf32>
    %cst_14 = arith.constant dense<0.000000e+00> : vector<16x32xf32>
    %31 = tpu.matmul %30, %2, %cst_14 {dimension_numbers = #tpu.dot_dimension_numbers<[1], [0], [0], [1], [0, 0, 1, 1], [], []>} : vector<16x128xf32>, vector<128x32xf32>, vector<16x32xf32> -> vector<16x32xf32>
    %32 = vector.broadcast %3 : vector<1x32xf32> to vector<16x32xf32>
    %33 = arith.addf %31, %32 : vector<16x32xf32>
    %34 = vector.extract_strided_slice %0 {offsets = [0, 64], sizes = [16, 32], strides = [1, 1]} : vector<16x256xf32> to vector<16x32xf32>
    %35 = vector.extract_strided_slice %9 {offsets = [0, 64], sizes = [16, 32], strides = [1, 1]} : vector<16x256xf32> to vector<16x32xf32>
    %36 = vector.extract_strided_slice %13 {offsets = [0, 64], sizes = [16, 32], strides = [1, 1]} : vector<16x256xf32> to vector<16x32xf32>
    %37 = vector.extract_strided_slice %17 {offsets = [0, 64], sizes = [16, 32], strides = [1, 1]} : vector<16x256xf32> to vector<16x32xf32>
    %38 = tpu.concatenate %34, %35, %36, %37 in 1 : vector<16x32xf32>, vector<16x32xf32>, vector<16x32xf32>, vector<16x32xf32> -> vector<16x128xf32>
    %cst_15 = arith.constant dense<0.000000e+00> : vector<16x32xf32>
    %39 = tpu.matmul %38, %2, %cst_15 {dimension_numbers = #tpu.dot_dimension_numbers<[1], [0], [0], [1], [0, 0, 1, 1], [], []>} : vector<16x128xf32>, vector<128x32xf32>, vector<16x32xf32> -> vector<16x32xf32>
    %40 = vector.broadcast %3 : vector<1x32xf32> to vector<16x32xf32>
    %41 = arith.addf %39, %40 : vector<16x32xf32>
    %42 = vector.extract_strided_slice %0 {offsets = [0, 96], sizes = [16, 32], strides = [1, 1]} : vector<16x256xf32> to vector<16x32xf32>
    %43 = vector.extract_strided_slice %9 {offsets = [0, 96], sizes = [16, 32], strides = [1, 1]} : vector<16x256xf32> to vector<16x32xf32>
    %44 = vector.extract_strided_slice %13 {offsets = [0, 96], sizes = [16, 32], strides = [1, 1]} : vector<16x256xf32> to vector<16x32xf32>
    %45 = vector.extract_strided_slice %17 {offsets = [0, 96], sizes = [16, 32], strides = [1, 1]} : vector<16x256xf32> to vector<16x32xf32>
    %46 = tpu.concatenate %42, %43, %44, %45 in 1 : vector<16x32xf32>, vector<16x32xf32>, vector<16x32xf32>, vector<16x32xf32> -> vector<16x128xf32>
    %cst_16 = arith.constant dense<0.000000e+00> : vector<16x32xf32>
    %47 = tpu.matmul %46, %2, %cst_16 {dimension_numbers = #tpu.dot_dimension_numbers<[1], [0], [0], [1], [0, 0, 1, 1], [], []>} : vector<16x128xf32>, vector<128x32xf32>, vector<16x32xf32> -> vector<16x32xf32>
    %48 = vector.broadcast %3 : vector<1x32xf32> to vector<16x32xf32>
    %49 = arith.addf %47, %48 : vector<16x32xf32>
    %50 = vector.extract_strided_slice %0 {offsets = [0, 128], sizes = [16, 32], strides = [1, 1]} : vector<16x256xf32> to vector<16x32xf32>
    %51 = vector.extract_strided_slice %9 {offsets = [0, 128], sizes = [16, 32], strides = [1, 1]} : vector<16x256xf32> to vector<16x32xf32>
    %52 = vector.extract_strided_slice %13 {offsets = [0, 128], sizes = [16, 32], strides = [1, 1]} : vector<16x256xf32> to vector<16x32xf32>
    %53 = vector.extract_strided_slice %17 {offsets = [0, 128], sizes = [16, 32], strides = [1, 1]} : vector<16x256xf32> to vector<16x32xf32>
    %54 = tpu.concatenate %50, %51, %52, %53 in 1 : vector<16x32xf32>, vector<16x32xf32>, vector<16x32xf32>, vector<16x32xf32> -> vector<16x128xf32>
    %cst_17 = arith.constant dense<0.000000e+00> : vector<16x32xf32>
    %55 = tpu.matmul %54, %2, %cst_17 {dimension_numbers = #tpu.dot_dimension_numbers<[1], [0], [0], [1], [0, 0, 1, 1], [], []>} : vector<16x128xf32>, vector<128x32xf32>, vector<16x32xf32> -> vector<16x32xf32>
    %56 = vector.broadcast %3 : vector<1x32xf32> to vector<16x32xf32>
    %57 = arith.addf %55, %56 : vector<16x32xf32>
    %58 = vector.extract_strided_slice %0 {offsets = [0, 160], sizes = [16, 32], strides = [1, 1]} : vector<16x256xf32> to vector<16x32xf32>
    %59 = vector.extract_strided_slice %9 {offsets = [0, 160], sizes = [16, 32], strides = [1, 1]} : vector<16x256xf32> to vector<16x32xf32>
    %60 = vector.extract_strided_slice %13 {offsets = [0, 160], sizes = [16, 32], strides = [1, 1]} : vector<16x256xf32> to vector<16x32xf32>
    %61 = vector.extract_strided_slice %17 {offsets = [0, 160], sizes = [16, 32], strides = [1, 1]} : vector<16x256xf32> to vector<16x32xf32>
    %62 = tpu.concatenate %58, %59, %60, %61 in 1 : vector<16x32xf32>, vector<16x32xf32>, vector<16x32xf32>, vector<16x32xf32> -> vector<16x128xf32>
    %cst_18 = arith.constant dense<0.000000e+00> : vector<16x32xf32>
    %63 = tpu.matmul %62, %2, %cst_18 {dimension_numbers = #tpu.dot_dimension_numbers<[1], [0], [0], [1], [0, 0, 1, 1], [], []>} : vector<16x128xf32>, vector<128x32xf32>, vector<16x32xf32> -> vector<16x32xf32>
    %64 = vector.broadcast %3 : vector<1x32xf32> to vector<16x32xf32>
    %65 = arith.addf %63, %64 : vector<16x32xf32>
    %66 = vector.extract_strided_slice %0 {offsets = [0, 192], sizes = [16, 32], strides = [1, 1]} : vector<16x256xf32> to vector<16x32xf32>
    %67 = vector.extract_strided_slice %9 {offsets = [0, 192], sizes = [16, 32], strides = [1, 1]} : vector<16x256xf32> to vector<16x32xf32>
    %68 = vector.extract_strided_slice %13 {offsets = [0, 192], sizes = [16, 32], strides = [1, 1]} : vector<16x256xf32> to vector<16x32xf32>
    %69 = vector.extract_strided_slice %17 {offsets = [0, 192], sizes = [16, 32], strides = [1, 1]} : vector<16x256xf32> to vector<16x32xf32>
    %70 = tpu.concatenate %66, %67, %68, %69 in 1 : vector<16x32xf32>, vector<16x32xf32>, vector<16x32xf32>, vector<16x32xf32> -> vector<16x128xf32>
    %cst_19 = arith.constant dense<0.000000e+00> : vector<16x32xf32>
    %71 = tpu.matmul %70, %2, %cst_19 {dimension_numbers = #tpu.dot_dimension_numbers<[1], [0], [0], [1], [0, 0, 1, 1], [], []>} : vector<16x128xf32>, vector<128x32xf32>, vector<16x32xf32> -> vector<16x32xf32>
    %72 = vector.broadcast %3 : vector<1x32xf32> to vector<16x32xf32>
    %73 = arith.addf %71, %72 : vector<16x32xf32>
    %74 = vector.extract_strided_slice %0 {offsets = [0, 224], sizes = [16, 32], strides = [1, 1]} : vector<16x256xf32> to vector<16x32xf32>
    %75 = vector.extract_strided_slice %9 {offsets = [0, 224], sizes = [16, 32], strides = [1, 1]} : vector<16x256xf32> to vector<16x32xf32>
    %76 = vector.extract_strided_slice %13 {offsets = [0, 224], sizes = [16, 32], strides = [1, 1]} : vector<16x256xf32> to vector<16x32xf32>
    %77 = vector.extract_strided_slice %17 {offsets = [0, 224], sizes = [16, 32], strides = [1, 1]} : vector<16x256xf32> to vector<16x32xf32>
    %78 = tpu.concatenate %74, %75, %76, %77 in 1 : vector<16x32xf32>, vector<16x32xf32>, vector<16x32xf32>, vector<16x32xf32> -> vector<16x128xf32>
    %cst_20 = arith.constant dense<0.000000e+00> : vector<16x32xf32>
    %79 = tpu.matmul %78, %2, %cst_20 {dimension_numbers = #tpu.dot_dimension_numbers<[1], [0], [0], [1], [0, 0, 1, 1], [], []>} : vector<16x128xf32>, vector<128x32xf32>, vector<16x32xf32> -> vector<16x32xf32>
    %80 = vector.broadcast %3 : vector<1x32xf32> to vector<16x32xf32>
    %81 = arith.addf %79, %80 : vector<16x32xf32>
    %82 = tpu.concatenate %25, %33, %41, %49, %57, %65, %73, %81 in 1 : vector<16x32xf32>, vector<16x32xf32>, vector<16x32xf32>, vector<16x32xf32>, vector<16x32xf32>, vector<16x32xf32>, vector<16x32xf32>, vector<16x32xf32> -> vector<16x256xf32>
    %c0_21 = arith.constant 0 : index
    %c0_22 = arith.constant 0 : index
    %83 = vector.load %arg5[%c0_21, %c0_22] : memref<16x256xf32, #tpu.memory_space<vmem>>, vector<16x256xf32>
    tpu.vector_store %arg5[%c0_21, %c0_22], %82 {strides = array<i32>} : memref<16x256xf32, #tpu.memory_space<vmem>>, vector<16x256xf32>,
    return
  }
  func.func @transform_0(%arg0: i32) -> (i32, i32) {
    %c0_i32 = arith.constant 0 : i32
    %c0_i32_0 = arith.constant 0 : i32
    return %c0_i32, %arg0 : i32, i32
  }
  func.func @transform_1(%arg0: i32) -> (i32, i32) {
    %c0_i32 = arith.constant 0 : i32
    %c0_i32_0 = arith.constant 0 : i32
    %c0_i32_1 = arith.constant 0 : i32
    return %c0_i32, %c0_i32_0 : i32, i32
  }
  func.func @transform_2(%arg0: i32) -> (i32, i32) {
    %c0_i32 = arith.constant 0 : i32
    %c0_i32_0 = arith.constant 0 : i32
    %c0_i32_1 = arith.constant 0 : i32
    return %c0_i32, %c0_i32_0 : i32, i32
  }
  func.func @transform_3(%arg0: i32) -> (i32, i32) {
    %c0_i32 = arith.constant 0 : i32
    %c0_i32_0 = arith.constant 0 : i32
    %c0_i32_1 = arith.constant 0 : i32
    return %c0_i32, %c0_i32_0 : i32, i32
  }
  func.func @transform_4(%arg0: i32) -> (i32, i32) {
    %c0_i32 = arith.constant 0 : i32
    %c0_i32_0 = arith.constant 0 : i32
    return %c0_i32, %arg0 : i32, i32
  }
}

</mosaic_0001>

<bundles_post_ra>
// kernel: mixprop_pallas.1
= control target key start
LH: loop header
LB: loop body
LE: loop exit
PB: predicated region body
PF: predicated region fallthrough
CT: control target
= control target key end

     0   :  { %s2132_s15 = smov 0   ;;  %s2134_s16 = smov 0   ;;  %s2845_s0 = inlined_call_operand.vmem [shape: f32[16,512], index: 0, kind: input, shape index: {}]   ;;  %s2846_s1 = inlined_call_operand.vmem [shape: f32[16,16], index: 1, kind: input, shape index: {}]   ;;  %s2847_s2 = inlined_call_operand.vmem [shape: f32[128,32], index: 2, kind: input, shape index: {}]   ;;  %s2848_s3 = inlined_call_operand.vmem [shape: f32[1,32], index: 3, kind: input, shape index: {}]   ;;  %s2849_s4 = inlined_call_operand.vmem [shape: f32[16,512], index: 4, kind: output, shape index: {}]  }
   0x1   :  { %s2136_s17 = smov 0  }
   0x2 LB: > { %s1479_s18 = sadd.s32 4294967295, %s2101_s17   ;;  %s2149_s19 = sadd.s32 1, %s2101_s17   ;;  %s2101_s17 = sphi %s2136_s17, %s2853_s17   ;;  %s2097_s16 = sphi %s2134_s16, %s2852_s16   ;;  %s2093_s15 = sphi %s2132_s15, %s2851_s15  }
   0x3   : > { %s18_s20 = ssub.s32 %s2101_s17, %s2149_s19  ;;  %s21_s21 = sadd.s32 1, %s2097_s16 }
   0x4   : > { %p19_p0 = scmp.eq.s32.totalorder %s18_s20, 0  ;;  %p28_p1 = scmp.ne.s32.totalorder %s2097_s16, %s2093_s15 }
   0x5   : > { %p29_p2 = scmp.eq.s32.totalorder %s2101_s17, 0  ;;  %p121_p3 = scmp.eq.s32.totalorder %s1479_s18, 1 }
   0x6   : > { %s2160_s22 = scalar_select %p19_p0, %s2097_s16, %s21_s21  }
   0x7   : > { %p30_p4 = por %p29_p2, %p28_p1  ;;  %p2162_p5 = por %p121_p3, %p28_p1 }
   0x8   : > { %p1482_p6 = scmp.ge.s32.totalorder %s2101_s17, 2 }
   0xa   : > { %152 = sbr.rel (%p1482_p6) target bundleno = 21 (0x15), region = 28 }
   0xf   : > { %155 = sbr.rel (!%p30_p4) target bundleno = 21 (0x15), region = 32  ;;  %s157_s24 = sand.u32 (%p30_p4), 1, %s2097_s16  }
  0x10   : > { %s1501_s25 = sshll.u32 (%p30_p4), %s2101_s17, 4  ;;  %s1483_s26 = sshll.u32 (%p30_p4), %s157_s24, 5 }
  0x11   : > { %s162_s29 = scalar_lea.vmem (%p30_p4), %s2845_s0, %s1501_s25  ;;  %s159_s30 = scalar_lea.vmem (%p30_p4), [#allocation2], %s1483_s26 }
  0x12   : > { %v175_v0 = vld [vmem:[%s162_s29] sm:$0xff] (%p30_p4)  ;;  %v177_v1 = vld [vmem:[%s162_s29 + $0x8] sm:$0xff] (%p30_p4) }
  0x13   : > { %v179_v2 = vld [vmem:[%s162_s29 + $0x20] sm:$0xff] (%p30_p4)  ;;  %176 = vst [vmem:[%s159_s30] sm:$0xff] (%p30_p4), %v175_v0  ;;  %178 = vst [vmem:[%s159_s30 + $0x8] sm:$0xff] (%p30_p4), %v177_v1  ;;  %v181_v3 = vld [vmem:[%s162_s29 + $0x28] sm:$0xff] (%p30_p4) }
  0x14   : > { %180 = vst [vmem:[%s159_s30 + $0x10] sm:$0xff] %v179_v2  ;;  %182 = vst [vmem:[%s159_s30 + $0x18] sm:$0xff] %v181_v3 }
  0x15 PF: > { %p1486_p7 = scmp.ge.s32.totalorder %s2101_s17, 1  ;;  %p187_p8 = scmp.lt.s32.totalorder %s2101_s17, 3 }
  0x17   : > { %p188_p9 = pnand %p1486_p7, %p187_p8 }
  0x18   : > { %s194_s5 = sand.u32 (!%p188_p9), 1, %s2093_s15   ;;  %s2104_s12 = smov (!%p188_p9), 32  }
  0x19   : > { %191 = sbr.rel (%p188_p9) target bundleno = 1195 (0x4ab), region = 55  ;;  %s2175_s6 = sshll.u32 (!%p188_p9), %s194_s5, 5 }
  0x1a   : > { %s196_s7 = scalar_lea.vmem (!%p188_p9), [#allocation2], %s2175_s6  ;;  %s2105_s13 = smov (!%p188_p9), 64  }
  0x1b   : > { %s2106_s10 = smov (!%p188_p9), 96  }
  0x1e   : > { %v2103_v4 = vmov 0.0   ;;  %v2180_v5 = vld [vmem:[%s196_s7 + $0x18] sm:$0xff]  ;;  %v2182_v6 = vld [vmem:[%s196_s7 + $0x10] sm:$0xff]  ;;  %v2184_v7 = vld [vmem:[%s196_s7 + $0x8] sm:$0xff]  ;;  %vm247_vm0 = vcmask 130048   ;;  %vm533_vm1 = vcmask 261120  }
  0x1f   : > { %318 = vmatprep.mubr.f32.mxu0 %v2103_v4  ;;  %324 = vmatprep.mubr.f32.mxu1 %v2103_v4  ;;  %v2188_v8 = vld [vmem:[%s196_s7] sm:$0xff]  ;;  %v225_v10 = vld [vmem:[%s2846_s1 + $0x8] sm:$0xff]  ;;  %v2210_v12 = vmul.f32 0.05, %v2182_v6  ;;  %v2213_v17 = vmul.f32 0.05, %v2180_v5 }
  0x20   : > { %282 = vmatprep.subr.mxu0 %v2180_v5  ;;  %1927 = vmatprep.subr.mxu1 %v2180_v5  ;;  %v224_v9 = vld [vmem:[%s2846_s1] sm:$0xff]  ;;  %v2207_v11 = vmul.f32 0.05, %v2188_v8  ;;  %v2216_v18 = vmul.f32 0.05, %v2184_v7  ;;  %v1989_v41 = vpack.i.bf16 %v2182_v6, %v2188_v8  ;;  %v2276_v42 = vld [vmem:[%s2847_s2 + $0x78] sm:$0xff] }
  0x21   : > { %283 = vmatpush1.msra.mxu0 %v2182_v6  ;;  %1929 = vmatpush1.msra.mxu1 %v2182_v6  ;;  %v2281_v43 = vld [vmem:[%s2847_s2 + $0x70] sm:$0xff]  ;;  %v2289_v44 = vld [vmem:[%s2847_s2 + $0x68] sm:$0xff]  ;;  %v2298_v45 = vld [vmem:[%s2847_s2 + $0x60] sm:$0xff]  ;;  %vm536_vm2 = vcmask 523264   ;;  %vm539_vm3 = vcmask 785408  }
  0x22   : > { %284 = vmatprep.subr.mxu0 %v2184_v7  ;;  %1928 = vmatprep.subr.mxu1 %v2184_v7  ;;  %v2307_v46 = vld [vmem:[%s2847_s2 + $0x58] sm:$0xff]  ;;  %v2316_v47 = vld [vmem:[%s2847_s2 + $0x50] sm:$0xff]  ;;  %v2325_v48 = vld [vmem:[%s2847_s2 + $0x48] sm:$0xff] }
  0x23   : > { %285 = vmatpush1.msra.mxu0 %v2188_v8  ;;  %1930 = vmatpush1.msra.mxu1 %v2188_v8  ;;  %v2334_v49 = vld [vmem:[%s2847_s2 + $0x40] sm:$0xff]  ;;  %v2343_v50 = vld [vmem:[%s2847_s2 + $0x38] sm:$0xff]  ;;  %v2352_v51 = vld [vmem:[%s2847_s2 + $0x30] sm:$0xff] }
  0x24   : > { %1489 = vmatmul.mubr.msk.f32.vlgmr.msra.gmra.mxu0 %vm247_vm0, %v224_v9  ;;  %1490 = vmatmul.mubr.msk.f32.vlgmr.msra.gmra.mxu1 %vm247_vm0, %v225_v10  ;;  %v2361_v52 = vld [vmem:[%s2847_s2 + $0x28] sm:$0xff]  ;;  %v2370_v53 = vld [vmem:[%s2847_s2 + $0x20] sm:$0xff]  ;;  %v2379_v54 = vld [vmem:[%s2847_s2 + $0x18] sm:$0xff] }
  0x25   : > { %403 = vmatprep.mubr.f32.mxu1 %v2103_v4  ;;  %488 = vmatprep.mubr.f32.mxu0 %v2103_v4  ;;  %v2393_v55 = vld [vmem:[%s2847_s2 + $0x10] sm:$0xff]  ;;  %v2398_v56 = vld [vmem:[%s2847_s2 + $0x8] sm:$0xff]  ;;  %v2410_v57 = vld [vmem:[%s2847_s2] sm:$0xff] }
  0xe4   : > { %v320_v13 = vpop.f32.mrf.mxu0  ;;  %v326_v14 = vpop.f32.mrf.mxu1 }
  0xe5   : > { %v331_v15 = vmul.f32 0.95, %v320_v13  ;;  %v333_v16 = vmul.f32 0.95, %v326_v14  ;;  %v2049_v14 = vpack.i.bf16 %v2180_v5, %v2184_v7 }
  0xe6   : > { %v322_v19 = vpop.f32.mrf.mxu0  ;;  %v328_v20 = vpop.f32.mrf.mxu1 }
  0xe7   : > { %v2219_v21 = vadd.f32 %v331_v15, %v2207_v11  ;;  %v2222_v22 = vadd.f32 %v333_v16, %v2210_v12  ;;  %v332_v23 = vmul.f32 0.95, %v322_v19  ;;  %v334_v24 = vmul.f32 0.95, %v328_v20 }
  0xe9   : > { %v2225_v25 = vadd.f32 %v334_v24, %v2213_v17  ;;  %v2229_v26 = vpack.i.bf16 %v2222_v22, %v2219_v21  ;;  %v2232_v27 = vadd.f32 %v332_v23, %v2216_v18 }
  0xeb   : > { %367 = vmatprep.subr.mxu1 %v2225_v25  ;;  %1960 = vrot.lane.b32.xlu0 %v2229_v26, %s2104_s12 }
  0xec   : > { %368 = vmatpush1.msra.mxu1 %v2222_v22 }
  0xed   : > { %369 = vmatprep.subr.mxu1 %v2232_v27 }
  0xee   : > { %370 = vmatpush1.msra.mxu1 %v2219_v21 }
  0xef   : > { %1491 = vmatmul.mubr.msk.f32.vlgmr.msra.gmra.mxu1 %vm247_vm0, %v224_v9  ;;  %1647 = vmatprep.subr.mxu1 %v2276_v42 }
  0xf0   : > { %409 = vmatprep.mubr.f32.mxu1 %v2103_v4  ;;  %1648 = vmatpush3.msra.mxu1 %v2276_v42 }
  0xf1   : > { %1649 = vmatprep.subr.mxu1 %v2281_v43 }
  0xf2   : > { %1650 = vmatpush3.msra.mxu1 %v2281_v43 }
  0xf3   : > { %1492 = vmatmul.mubr.msk.f32.gmra.mxu1 %vm247_vm0, %v225_v10  ;;  %1651 = vmatprep.subr.mxu1 %v2289_v44 }
  0xf4   : > { %1652 = vmatpush3.msra.mxu1 %v2289_v44 }
  0xf5   : > { %1653 = vmatprep.subr.mxu1 %v2298_v45 }
  0xf6   : > { %1654 = vmatpush3.msra.mxu1 %v2298_v45 }
  0xf7   : > { %1655 = vmatprep.subr.mxu1 %v2307_v46 }
  0xf8   : > { %1656 = vmatpush3.msra.mxu1 %v2307_v46 }
  0xf9   : > { %1657 = vmatprep.subr.mxu1 %v2316_v47 }
  0xfa   : > { %1658 = vmatpush3.msra.mxu1 %v2316_v47 }
  0xfb   : > { %1659 = vmatprep.subr.mxu1 %v2325_v48 }
  0xfc   : > { %1660 = vmatpush3.msra.mxu1 %v2325_v48 }
  0xfd   : > { %1661 = vmatprep.subr.mxu1 %v2334_v49 }
  0xfe   : > { %1662 = vmatpush3.msra.mxu1 %v2334_v49 }
  0xff   : > { %1663 = vmatprep.subr.mxu1 %v2343_v50 }
 0x100   : > { %1664 = vmatpush3.msra.mxu1 %v2343_v50 }
 0x101   : > { %1665 = vmatprep.subr.mxu1 %v2352_v51 }
 0x102   : > { %1666 = vmatpush3.msra.mxu1 %v2352_v51 }
 0x103   : > { %1667 = vmatprep.subr.mxu1 %v2361_v52 }
 0x104   : > { %1668 = vmatpush3.msra.mxu1 %v2361_v52 }
 0x105   : > { %1669 = vmatprep.subr.mxu1 %v2370_v53 }
 0x106   : > { %1670 = vmatpush3.msra.mxu1 %v2370_v53 }
 0x107   : > { %1671 = vmatprep.subr.mxu1 %v2379_v54 }
 0x108   : > { %1672 = vmatpush3.msra.mxu1 %v2379_v54 }
 0x109   : > { %1673 = vmatprep.subr.mxu1 %v2393_v55 }
 0x10a   : > { %1674 = vmatpush3.msra.mxu1 %v2393_v55 }
 0x10b   : > { %1675 = vmatprep.subr.mxu1 %v2398_v56 }
 0x10c   : > { %1676 = vmatpush3.msra.mxu1 %v2398_v56 }
 0x10d   : > { %1677 = vmatprep.subr.mxu1 %v2410_v57 }
 0x10e   : > { %1678 = vmatpush3.msra.mxu1 %v2410_v57 }
 0x10f   : > { %1717 = vmatprep.subr.mxu1 %v2276_v42 }
 0x1af   : > { %v405_v28 = vpop.f32.mrf.mxu1 }
 0x1b0   : > { %v416_v30 = vmul.f32 0.95, %v405_v28 }
 0x1b1   : > { %v407_v29 = vpop.f32.mrf.mxu1 }
 0x1b2   : > { %v2244_v34 = vadd.f32 %v416_v30, %v2207_v11  ;;  %v417_v35 = vmul.f32 0.95, %v407_v29 }
 0x1b3   : > { %v411_v31 = vpop.f32.mrf.mxu1 }
 0x1b4   : > { %v418_v32 = vmul.f32 0.95, %v411_v31  ;;  %v2257_v40 = vadd.f32 %v417_v35, %v2216_v18 }
 0x1b5   : > { %v413_v33 = vpop.f32.mrf.mxu1 }
 0x1b6   : > { %v2247_v36 = vadd.f32 %v418_v32, %v2210_v12  ;;  %v419_v37 = vmul.f32 0.95, %v413_v33 }
 0x1b8   : > { %v2250_v38 = vadd.f32 %v419_v37, %v2213_v17  ;;  %v2254_v39 = vpack.i.bf16 %v2247_v36, %v2244_v34 }
 0x1ba   : > { %1965 = vrot.lane.b32.xlu0 %v2254_v39, %s2105_s13  ;;  %452 = vmatprep.subr.mxu0 %v2250_v38 }
 0x1bb   : > { %453 = vmatpush1.msra.mxu0 %v2247_v36 }
 0x1bc   : > { %454 = vmatprep.subr.mxu0 %v2257_v40 }
 0x1bd   : > { %455 = vmatpush1.msra.mxu0 %v2244_v34 }
 0x1be   : > { %1970 = vrot.lane.b32.xlu0 %v2254_v39, %s2104_s12  ;;  %1493 = vmatmul.mubr.msk.f32.vlgmr.msra.gmra.mxu0 %vm247_vm0, %v224_v9  ;;  %v2019_v9 = vpack.i.bf16 %v2225_v25, %v2232_v27 }
 0x1bf   : > { %494 = vmatprep.mubr.f32.mxu0 %v2103_v4  ;;  %1682 = vmatprep.subr.mxu0 %v2276_v42 }
 0x1c0   : > { %1683 = vmatpush3.msra.mxu0 %v2276_v42 }
 0x1c1   : > { %1684 = vmatprep.subr.mxu0 %v2281_v43 }
 0x1c2   : > { %1494 = vmatmul.mubr.msk.f32.gmra.mxu0 %vm247_vm0, %v225_v10  ;;  %1990 = vrot.lane.b32.xlu0 %v1989_v41, %s2105_s13 }
 0x1c3   : > { %1685 = vmatpush3.msra.mxu0 %v2281_v43 }
 0x1c4   : > { %1686 = vmatprep.subr.mxu0 %v2289_v44 }
 0x1c5   : > { %1687 = vmatpush3.msra.mxu0 %v2289_v44 }
 0x1c6   : > { %1688 = vmatprep.subr.mxu0 %v2298_v45 }
 0x1c7   : > { %1689 = vmatpush3.msra.mxu0 %v2298_v45 }
 0x1c8   : > { %1690 = vmatprep.subr.mxu0 %v2307_v46 }
 0x1c9   : > { %1691 = vmatpush3.msra.mxu0 %v2307_v46 }
 0x1ca   : > { %1692 = vmatprep.subr.mxu0 %v2316_v47 }
 0x1cb   : > { %1693 = vmatpush3.msra.mxu0 %v2316_v47 }
 0x1cc   : > { %1694 = vmatprep.subr.mxu0 %v2325_v48 }
 0x1cd   : > { %1695 = vmatpush3.msra.mxu0 %v2325_v48 }
 0x1ce   : > { %1696 = vmatprep.subr.mxu0 %v2334_v49 }
 0x1cf   : > { %1697 = vmatpush3.msra.mxu0 %v2334_v49 }
 0x1d0   : > { %1698 = vmatprep.subr.mxu0 %v2343_v50 }
 0x1d1   : > { %1699 = vmatpush3.msra.mxu0 %v2343_v50 }
 0x1d2   : > { %1700 = vmatprep.subr.mxu0 %v2352_v51 }
 0x1d3   : > { %1701 = vmatpush3.msra.mxu0 %v2352_v51 }
 0x1d4   : > { %1702 = vmatprep.subr.mxu0 %v2361_v52 }
 0x1d5   : > { %1703 = vmatpush3.msra.mxu0 %v2361_v52 }
 0x1d6   : > { %1704 = vmatprep.subr.mxu0 %v2370_v53 }
 0x1d7   : > { %1705 = vmatpush3.msra.mxu0 %v2370_v53 }
 0x1d8   : > { %1706 = vmatprep.subr.mxu0 %v2379_v54 }
 0x1d9   : > { %1707 = vmatpush3.msra.mxu0 %v2379_v54 }
 0x1da   : > { %1708 = vmatprep.subr.mxu0 %v2393_v55 }
 0x1db   : > { %1709 = vmatpush3.msra.mxu0 %v2393_v55 }
 0x1dc   : > { %1710 = vmatprep.subr.mxu0 %v2398_v56 }
 0x1dd   : > { %1711 = vmatpush3.msra.mxu0 %v2398_v56 }
 0x1de   : > { %1712 = vmatprep.subr.mxu0 %v2410_v57 }
 0x1df   : > { %1713 = vmatpush3.msra.mxu0 %v2410_v57 }
 0x1e0   : > { %1752 = vmatprep.subr.mxu0 %v2276_v42 }
 0x27e   : > { %v490_v58 = vpop.f32.mrf.mxu0 }
 0x27f   : > { %v501_v59 = vmul.f32 0.95, %v490_v58 }
 0x280   : > { %v492_v60 = vpop.f32.mrf.mxu0 }
 0x281   : > { %v2420_v61 = vadd.f32 %v501_v59, %v2207_v11  ;;  %v502_v2 = vmul.f32 0.95, %v492_v60 }
 0x282   : > { %v496_v62 = vpop.f32.mrf.mxu0 }
 0x283   : > { %v503_v63 = vmul.f32 0.95, %v496_v62  ;;  %v1999_v0 = vpack.i.bf16 %v2420_v61, %v2188_v8  ;;  %v2434_v4 = vadd.f32 %v502_v2, %v2216_v18 }
 0x284   : > { %v498_v13 = vpop.f32.mrf.mxu0 }
 0x285   : > { %v2425_v1 = vadd.f32 %v503_v63, %v2210_v12  ;;  %2000 = vrot.lane.b32.xlu0 %v1999_v0, %s2104_s12  ;;  %1975 = vrot.lane.b32.xlu1 %v1999_v0, %s2106_s10  ;;  %v2029_v11 = vpack.i.bf16 %v2434_v4, %v2184_v7  ;;  %v2034_v12 = vpack.i.bf16 %v2250_v38, %v2257_v40  ;;  %v504_v15 = vmul.f32 0.95, %v498_v13 }
 0x287   : > { %v2009_v3 = vpack.i.bf16 %v2425_v1, %v2182_v6  ;;  %v1984_v10 = vpack.i.bf16 %v2425_v1, %v2420_v61  ;;  %v2458_v16 = vadd.f32 %v504_v15, %v2213_v17  ;;  %v1961_v17 = vpop.permute.xlu0 %1960 }
 0x288   : > { %v1962_v23 = vunpack.i.l.bf16 %v1961_v17  ;;  %v1963_v28 = vunpack.i.h.bf16 %v1961_v17 }
 0x289   : > { %2010 = vrot.lane.b32.xlu0 %v2009_v3, %s2104_s12  ;;  %1980 = vrot.lane.b32.xlu1 %v2009_v3, %s2106_s10  ;;  %v2069_v18 = vpack.i.bf16 %v2458_v16, %v2180_v5  ;;  %v2044_v19 = vpack.i.bf16 %v2458_v16, %v2434_v4 }
 0x28a   : > { %v534_v30 = vsel %vm533_vm1, %v2188_v8, %v1962_v23  ;;  %v535_v41 = vsel %vm533_vm1, %v2182_v6, %v1963_v28 }
 0x28b   : > { %v1966_v20 = vpop.permute.xlu0 %1965 }
 0x28c   : > { %v1967_v24 = vunpack.i.l.bf16 %v1966_v20  ;;  %v1968_v31 = vunpack.i.h.bf16 %v1966_v20 }
 0x28d   : > { %2020 = vrot.lane.b32.xlu0 %v2019_v9, %s2104_s12  ;;  %1985 = vrot.lane.b32.xlu1 %v1984_v10, %s2105_s13 }
 0x28e   : > { %v537_v32 = vsel %vm536_vm2, %v534_v30, %v1967_v24  ;;  %v538_v60 = vsel %vm536_vm2, %v535_v41, %v1968_v31 }
 0x28f   : > { %v1971_v33 = vpop.permute.xlu0 %1970 }
 0x290   : > { %v1973_v2 = vunpack.i.h.bf16 %v1971_v33  ;;  %v1972_v3 = vunpack.i.l.bf16 %v1971_v33 }
 0x291   : > { %2030 = vrot.lane.b32.xlu0 %v2029_v11, %s2106_s10  ;;  %1995 = vrot.lane.b32.xlu1 %v2229_v26, %s2106_s10 }
 0x293   : > { %v2479_v62 = vpop.permute.xlu0 %1990 }
 0x295   : > { %2035 = vrot.lane.b32.xlu0 %v2034_v12, %s2104_s12  ;;  %2005 = vrot.lane.b32.xlu1 %v2229_v26, %s2105_s13 }
 0x299   : > { %2050 = vrot.lane.b32.xlu0 %v2049_v14, %s2105_s13  ;;  %2015 = vrot.lane.b32.xlu1 %v2254_v39, %s2106_s10 }
 0x29d   : > { %2060 = vrot.lane.b32.xlu0 %v2029_v11, %s2104_s12  ;;  %2025 = vrot.lane.b32.xlu1 %v2034_v12, %s2105_s13 }
 0x2a1   : > { %2070 = vrot.lane.b32.xlu0 %v2069_v18, %s2104_s12  ;;  %2040 = vrot.lane.b32.xlu1 %v2069_v18, %s2106_s10 }
 0x2a5   : > { %2045 = vrot.lane.b32.xlu1 %v2044_v19, %s2105_s13 }
 0x2a9   : > { %2055 = vrot.lane.b32.xlu1 %v2019_v9, %s2106_s10 }
 0x2ad   : > { %2065 = vrot.lane.b32.xlu1 %v2019_v9, %s2105_s13 }
 0x2b1   : > { %2075 = vrot.lane.b32.xlu1 %v2034_v12, %s2106_s10 }
 0x2f7   : > { %v1976_v26 = vpop.permute.xlu1 %1975  ;;  %v2001_v15 = vpop.permute.xlu0 %2000 }
 0x2f8   : > { %v1978_v29 = vunpack.i.h.bf16 %v1976_v26  ;;  %v1977_v35 = vunpack.i.l.bf16 %v1976_v26  ;;  %v2003_v17 = vunpack.i.h.bf16 %v2001_v15  ;;  %v2002_v28 = vunpack.i.l.bf16 %v2001_v15 }
 0x2fa   : > { %v540_v37 = vsel %vm539_vm3, %v537_v32, %v1978_v29  ;;  %v643_v0 = vsel %vm533_vm1, %v1977_v35, %v2219_v21 }
 0x2fb   : > { %1679 = vmatprep.mubr.f32.mxu1 %v540_v37  ;;  %v1981_v39 = vpop.permute.xlu1 %1980  ;;  %v645_v11 = vsel %vm536_vm2, %v643_v0, %v1972_v3  ;;  %v2524_v30 = vpop.permute.xlu0 %2010 }
 0x2fc   : > { %v1983_v58 = vunpack.i.h.bf16 %v1981_v39  ;;  %v1982_v59 = vunpack.i.l.bf16 %v1981_v39 }
 0x2fe   : > { %v644_v8 = vsel %vm533_vm1, %v1982_v59, %v2222_v22  ;;  %v541_v63 = vsel %vm539_vm3, %v538_v60, %v1983_v58  ;;  %v1992_v22 = vunpack.i.l.bf16 %v2479_v62 }
 0x2ff   : > { %v1986_v9 = vpop.permute.xlu1 %1985  ;;  %1680 = vmatmul.mubr.f32.vlgmr.msra.gmra.mxu1 %v541_v63  ;;  %v646_v12 = vsel %vm536_vm2, %v644_v8, %v1973_v2  ;;  %v2541_v35 = vpop.permute.xlu0 %2020  ;;  %v2013_v63 = vunpack.i.h.bf16 %v2524_v30 }
 0x300   : > { %v1988_v10 = vunpack.i.h.bf16 %v1986_v9  ;;  %v1987_v6 = vunpack.i.l.bf16 %v1986_v9  ;;  %1718 = vmatpush3.msra.mxu1 %v2276_v42  ;;  %v2022_v41 = vunpack.i.l.bf16 %v2541_v35 }
 0x301   : > { %1719 = vmatprep.subr.mxu1 %v2281_v43 }
 0x302   : > { %1720 = vmatpush3.msra.mxu1 %v2281_v43  ;;  %v647_v21 = vsel %vm539_vm3, %v645_v11, %v1987_v6  ;;  %v648_v13 = vsel %vm539_vm3, %v646_v12, %v1988_v10  ;;  %v946_v2 = vsel %vm533_vm1, %v2184_v7, %v2022_v41 }
 0x303   : > { %1721 = vmatprep.subr.mxu1 %v2289_v44  ;;  %v2495_v14 = vpop.permute.xlu1 %1995  ;;  %1714 = vmatprep.mubr.f32.mxu0 %v647_v21  ;;  %v2031_v58 = vpop.permute.xlu0 %2030 }
 0x304   : > { %v1997_v18 = vunpack.i.l.bf16 %v2495_v14  ;;  %1722 = vmatpush3.msra.mxu1 %v2289_v44  ;;  %1715 = vmatmul.mubr.f32.vlgmr.msra.gmra.mxu0 %v648_v13  ;;  %v1998_v39 = vunpack.i.h.bf16 %v2495_v14  ;;  %v2033_v10 = vunpack.i.h.bf16 %v2031_v58  ;;  %v2032_v12 = vunpack.i.l.bf16 %v2031_v58 }
 0x305   : > { %1723 = vmatprep.subr.mxu1 %v2298_v45  ;;  %1753 = vmatpush3.msra.mxu0 %v2276_v42 }
 0x306   : > { %1724 = vmatpush3.msra.mxu1 %v2298_v45  ;;  %1754 = vmatprep.subr.mxu0 %v2281_v43  ;;  %v742_v19 = vsel %vm533_vm1, %v1992_v22, %v1997_v18 }
 0x307   : > { %1725 = vmatprep.subr.mxu1 %v2307_v46  ;;  %1755 = vmatpush3.msra.mxu0 %v2281_v43  ;;  %v2506_v20 = vpop.permute.xlu1 %2005  ;;  %v744_v23 = vsel %vm536_vm2, %v742_v19, %v2244_v34  ;;  %v2585_v6 = vpop.permute.xlu0 %2035  ;;  %v1047_v19 = vsel %vm533_vm1, %v2032_v12, %v2232_v27 }
 0x308   : > { %1726 = vmatpush3.msra.mxu1 %v2307_v46  ;;  %1756 = vmatprep.subr.mxu0 %v2289_v44  ;;  %v2007_v24 = vunpack.i.l.bf16 %v2506_v20  ;;  %v746_v26 = vsel %vm539_vm3, %v744_v23, %v2003_v17  ;;  %v2008_v0 = vunpack.i.h.bf16 %v2506_v20  ;;  %v2037_v13 = vunpack.i.l.bf16 %v2585_v6 }
 0x309   : > { %1727 = vmatprep.subr.mxu1 %v2316_v47  ;;  %1757 = vmatpush3.msra.mxu0 %v2289_v44 }
 0x30a   : > { %1728 = vmatpush3.msra.mxu1 %v2316_v47  ;;  %1749 = vmatprep.mubr.f32.mxu1 %v746_v26  ;;  %v841_v31 = vsel %vm533_vm1, %v2002_v28, %v2007_v24  ;;  %v1049_v17 = vsel %vm536_vm2, %v1047_v19, %v2037_v13  ;;  %v2023_v28 = vunpack.i.h.bf16 %v2541_v35 }
 0x30b   : > { %1758 = vmatprep.subr.mxu0 %v2298_v45  ;;  %1729 = vmatprep.subr.mxu1 %v2325_v48  ;;  %v2519_v34 = vpop.permute.xlu1 %2015 }
 0x30c   : > { %1759 = vmatpush3.msra.mxu0 %v2298_v45  ;;  %v2017_v29 = vunpack.i.l.bf16 %v2519_v34  ;;  %1730 = vmatpush3.msra.mxu1 %v2325_v48  ;;  %v2018_v3 = vunpack.i.h.bf16 %v2519_v34 }
 0x30d   : > { %1760 = vmatprep.subr.mxu0 %v2307_v46  ;;  %1731 = vmatprep.subr.mxu1 %v2334_v49 }
 0x30e   : > { %1761 = vmatpush3.msra.mxu0 %v2307_v46  ;;  %1732 = vmatpush3.msra.mxu1 %v2334_v49  ;;  %v843_v32 = vsel %vm536_vm2, %v841_v31, %v2017_v29 }
 0x30f   : > { %1762 = vmatprep.subr.mxu0 %v2316_v47  ;;  %1733 = vmatprep.subr.mxu1 %v2343_v50  ;;  %v845_v33 = vsel %vm539_vm3, %v843_v32, %v2420_v61  ;;  %v2545_v37 = vpop.permute.xlu1 %2025  ;;  %v1993_v61 = vunpack.i.h.bf16 %v2479_v62  ;;  %v947_v32 = vsel %vm533_vm1, %v2180_v5, %v2023_v28 }
 0x310   : > { %1763 = vmatpush3.msra.mxu0 %v2316_v47  ;;  %1734 = vmatpush3.msra.mxu1 %v2343_v50  ;;  %v2027_v60 = vunpack.i.l.bf16 %v2545_v37  ;;  %v2028_v34 = vunpack.i.h.bf16 %v2545_v37 }
 0x311   : > { %1764 = vmatprep.subr.mxu0 %v2325_v48  ;;  %1735 = vmatprep.subr.mxu1 %v2352_v51  ;;  %v743_v59 = vsel %vm533_vm1, %v1993_v61, %v1998_v39 }
 0x312   : > { %1765 = vmatpush3.msra.mxu0 %v2325_v48  ;;  %1784 = vmatprep.mubr.f32.mxu0 %v845_v33  ;;  %v745_v8 = vsel %vm536_vm2, %v743_v59, %v2247_v36  ;;  %v948_v9 = vsel %vm536_vm2, %v946_v2, %v2027_v60  ;;  %v2012_v36 = vunpack.i.l.bf16 %v2524_v30  ;;  %v949_v37 = vsel %vm536_vm2, %v947_v32, %v2028_v34 }
 0x313   : > { %1736 = vmatpush3.msra.mxu1 %v2352_v51  ;;  %1766 = vmatprep.subr.mxu0 %v2334_v49  ;;  %v2564_v62 = vpop.permute.xlu1 %2040  ;;  %v747_v11 = vsel %vm539_vm3, %v745_v8, %v2013_v63  ;;  %v950_v21 = vsel %vm539_vm3, %v948_v9, %v2033_v10  ;;  %v2038_v8 = vunpack.i.h.bf16 %v2585_v6 }
 0x314   : > { %1737 = vmatprep.subr.mxu1 %v2361_v52  ;;  %1767 = vmatpush3.msra.mxu0 %v2334_v49  ;;  %v842_v22 = vsel %vm533_vm1, %v2012_v36, %v2008_v0  ;;  %v2043_v29 = vunpack.i.h.bf16 %v2564_v62  ;;  %v2042_v33 = vunpack.i.l.bf16 %v2564_v62 }
 0x315   : > { %1738 = vmatpush3.msra.mxu1 %v2361_v52  ;;  %1768 = vmatprep.subr.mxu0 %v2343_v50  ;;  %v844_v14 = vsel %vm536_vm2, %v842_v22, %v2018_v3 }
 0x316   : > { %1739 = vmatprep.subr.mxu1 %v2370_v53  ;;  %1769 = vmatpush3.msra.mxu0 %v2343_v50  ;;  %v846_v18 = vsel %vm539_vm3, %v844_v14, %v2425_v1  ;;  %v2649_v1 = vpop.permute.xlu0 %2050  ;;  %v951_v41 = vsel %vm539_vm3, %v949_v37, %v2043_v29  ;;  %v1048_v60 = vsel %vm533_vm1, %v2042_v33, %v2225_v25 }
 0x317   : > { %1740 = vmatpush3.msra.mxu1 %v2370_v53  ;;  %1770 = vmatprep.subr.mxu0 %v2352_v51  ;;  %v2590_v7 = vpop.permute.xlu1 %2045  ;;  %v2052_v23 = vunpack.i.l.bf16 %v2649_v1  ;;  %v1050_v25 = vsel %vm536_vm2, %v1048_v60, %v2038_v8 }
 0x318   : > { %1741 = vmatprep.subr.mxu1 %v2379_v54  ;;  %1771 = vmatpush3.msra.mxu0 %v2352_v51  ;;  %v2047_v15 = vunpack.i.l.bf16 %v2590_v7 }
 0x319   : > { %1742 = vmatpush3.msra.mxu1 %v2379_v54  ;;  %1772 = vmatprep.subr.mxu0 %v2361_v52 }
 0x31a   : > { %1743 = vmatprep.subr.mxu1 %v2393_v55  ;;  %1773 = vmatpush3.msra.mxu0 %v2361_v52  ;;  %v1051_v20 = vsel %vm539_vm3, %v1049_v17, %v2047_v15  ;;  %v2061_v31 = vpop.permute.xlu0 %2060 }
 0x31b   : > { %1744 = vmatpush3.msra.mxu1 %v2393_v55  ;;  %1774 = vmatprep.subr.mxu0 %v2370_v53  ;;  %v2637_v27 = vpop.permute.xlu1 %2055  ;;  %v2063_v39 = vunpack.i.h.bf16 %v2061_v31  ;;  %v2062_v59 = vunpack.i.l.bf16 %v2061_v31 }
 0x31c   : > { %1745 = vmatprep.subr.mxu1 %v2398_v56  ;;  %1775 = vmatpush3.msra.mxu0 %v2370_v53  ;;  %v2057_v24 = vunpack.i.l.bf16 %v2637_v27 }
 0x31d   : > { %1746 = vmatpush3.msra.mxu1 %v2398_v56  ;;  %1776 = vmatprep.subr.mxu0 %v2379_v54 }
 0x31e   : > { %1747 = vmatprep.subr.mxu1 %v2410_v57  ;;  %1777 = vmatpush3.msra.mxu0 %v2379_v54  ;;  %v1146_v30 = vsel %vm533_vm1, %v2052_v23, %v2057_v24 }
 0x31f   : > { %1748 = vmatpush3.msra.mxu1 %v2410_v57  ;;  %1778 = vmatprep.subr.mxu0 %v2393_v55  ;;  %v2655_v26 = vpop.permute.xlu1 %2065  ;;  %v1148_v61 = vsel %vm536_vm2, %v1146_v30, %v2257_v40  ;;  %v2048_v40 = vunpack.i.h.bf16 %v2590_v7 }
 0x320   : > { %1750 = vmatmul.mubr.f32.vlgmr.msra.gmra.mxu1 %v747_v11  ;;  %1779 = vmatpush3.msra.mxu0 %v2393_v55  ;;  %v2067_v5 = vunpack.i.l.bf16 %v2655_v26  ;;  %v1150_v62 = vsel %vm539_vm3, %v1148_v61, %v2063_v39 }
 0x321   : > { %1787 = vmatprep.subr.mxu1 %v2276_v42  ;;  %1780 = vmatprep.subr.mxu0 %v2398_v56  ;;  %v1052_v2 = vsel %vm539_vm3, %v1050_v25, %v2048_v40 }
 0x322   : > { %1788 = vmatpush3.msra.mxu1 %v2276_v42  ;;  %1819 = vmatprep.mubr.f32.mxu1 %v950_v21  ;;  %v1245_v63 = vsel %vm533_vm1, %v2062_v59, %v2067_v5 }
 0x323   : > { %1781 = vmatpush3.msra.mxu0 %v2398_v56  ;;  %1789 = vmatprep.subr.mxu1 %v2281_v43  ;;  %v2676_v35 = vpop.permute.xlu1 %2075 }
 0x324   : > { %1782 = vmatprep.subr.mxu0 %v2410_v57  ;;  %1790 = vmatpush3.msra.mxu1 %v2281_v43  ;;  %v2077_v58 = vunpack.i.l.bf16 %v2676_v35 }
 0x325   : > { %1783 = vmatpush3.msra.mxu0 %v2410_v57  ;;  %1791 = vmatprep.subr.mxu1 %v2289_v44 }
 0x326   : > { %1785 = vmatmul.mubr.f32.vlgmr.msra.gmra.mxu0 %v846_v18  ;;  %1792 = vmatpush3.msra.mxu1 %v2289_v44  ;;  %v1247_v0 = vsel %vm536_vm2, %v1245_v63, %v2077_v58 }
 0x327   : > { %1822 = vmatprep.subr.mxu0 %v2276_v42  ;;  %1793 = vmatprep.subr.mxu1 %v2298_v45  ;;  %v1249_v3 = vsel %vm539_vm3, %v1247_v0, %v2434_v4 }
 0x328   : > { %1823 = vmatpush3.msra.mxu0 %v2276_v42  ;;  %1854 = vmatprep.mubr.f32.mxu0 %v1051_v20 }
 0x329   : > { %1794 = vmatpush3.msra.mxu1 %v2298_v45  ;;  %1824 = vmatprep.subr.mxu0 %v2281_v43 }
 0x32a   : > { %1795 = vmatprep.subr.mxu1 %v2307_v46  ;;  %1825 = vmatpush3.msra.mxu0 %v2281_v43 }
 0x32b   : > { %1796 = vmatpush3.msra.mxu1 %v2307_v46  ;;  %1826 = vmatprep.subr.mxu0 %v2289_v44 }
 0x32c   : > { %1797 = vmatprep.subr.mxu1 %v2316_v47  ;;  %1827 = vmatpush3.msra.mxu0 %v2289_v44 }
 0x32d   : > { %1798 = vmatpush3.msra.mxu1 %v2316_v47  ;;  %1828 = vmatprep.subr.mxu0 %v2298_v45 }
 0x32e   : > { %1799 = vmatprep.subr.mxu1 %v2325_v48  ;;  %1829 = vmatpush3.msra.mxu0 %v2298_v45 }
 0x32f   : > { %1800 = vmatpush3.msra.mxu1 %v2325_v48  ;;  %1830 = vmatprep.subr.mxu0 %v2307_v46 }
 0x330   : > { %1801 = vmatprep.subr.mxu1 %v2334_v49  ;;  %1831 = vmatpush3.msra.mxu0 %v2307_v46 }
 0x331   : > { %1802 = vmatpush3.msra.mxu1 %v2334_v49  ;;  %1832 = vmatprep.subr.mxu0 %v2316_v47 }
 0x332   : > { %1803 = vmatprep.subr.mxu1 %v2343_v50  ;;  %1833 = vmatpush3.msra.mxu0 %v2316_v47 }
 0x333   : > { %1804 = vmatpush3.msra.mxu1 %v2343_v50  ;;  %1834 = vmatprep.subr.mxu0 %v2325_v48 }
 0x334   : > { %1805 = vmatprep.subr.mxu1 %v2352_v51  ;;  %1835 = vmatpush3.msra.mxu0 %v2325_v48 }
 0x335   : > { %1806 = vmatpush3.msra.mxu1 %v2352_v51  ;;  %1836 = vmatprep.subr.mxu0 %v2334_v49 }
 0x336   : > { %1807 = vmatprep.subr.mxu1 %v2361_v52  ;;  %1837 = vmatpush3.msra.mxu0 %v2334_v49 }
 0x337   : > { %1808 = vmatpush3.msra.mxu1 %v2361_v52  ;;  %1838 = vmatprep.subr.mxu0 %v2343_v50 }
 0x338   : > { %1809 = vmatprep.subr.mxu1 %v2370_v53  ;;  %1839 = vmatpush3.msra.mxu0 %v2343_v50 }
 0x339   : > { %1810 = vmatpush3.msra.mxu1 %v2370_v53  ;;  %1840 = vmatprep.subr.mxu0 %v2352_v51 }
 0x33a   : > { %1811 = vmatprep.subr.mxu1 %v2379_v54  ;;  %1841 = vmatpush3.msra.mxu0 %v2352_v51 }
 0x33b   : > { %1812 = vmatpush3.msra.mxu1 %v2379_v54  ;;  %1842 = vmatprep.subr.mxu0 %v2361_v52 }
 0x33c   : > { %1813 = vmatprep.subr.mxu1 %v2393_v55  ;;  %1843 = vmatpush3.msra.mxu0 %v2361_v52 }
 0x33d   : > { %1814 = vmatpush3.msra.mxu1 %v2393_v55  ;;  %1844 = vmatprep.subr.mxu0 %v2370_v53 }
 0x33e   : > { %1815 = vmatprep.subr.mxu1 %v2398_v56  ;;  %1845 = vmatpush3.msra.mxu0 %v2370_v53 }
 0x33f   : > { %1816 = vmatpush3.msra.mxu1 %v2398_v56  ;;  %1846 = vmatprep.subr.mxu0 %v2379_v54 }
 0x340   : > { %1817 = vmatprep.subr.mxu1 %v2410_v57  ;;  %1847 = vmatpush3.msra.mxu0 %v2379_v54 }
 0x341   : > { %1818 = vmatpush3.msra.mxu1 %v2410_v57  ;;  %1848 = vmatprep.subr.mxu0 %v2393_v55 }
 0x342   : > { %1820 = vmatmul.mubr.f32.vlgmr.msra.gmra.mxu1 %v951_v41  ;;  %1849 = vmatpush3.msra.mxu0 %v2393_v55 }
 0x343   : > { %1857 = vmatprep.subr.mxu1 %v2276_v42  ;;  %1850 = vmatprep.subr.mxu0 %v2398_v56 }
 0x344   : > { %1858 = vmatpush3.msra.mxu1 %v2276_v42  ;;  %1889 = vmatprep.mubr.f32.mxu1 %v1150_v62 }
 0x345   : > { %1851 = vmatpush3.msra.mxu0 %v2398_v56  ;;  %1859 = vmatprep.subr.mxu1 %v2281_v43 }
 0x346   : > { %1852 = vmatprep.subr.mxu0 %v2410_v57  ;;  %1860 = vmatpush3.msra.mxu1 %v2281_v43 }
 0x347   : > { %1853 = vmatpush3.msra.mxu0 %v2410_v57  ;;  %1861 = vmatprep.subr.mxu1 %v2289_v44 }
 0x348   : > { %1855 = vmatmul.mubr.f32.vlgmr.msra.gmra.mxu0 %v1052_v2  ;;  %1862 = vmatpush3.msra.mxu1 %v2289_v44 }
 0x349   : > { %1892 = vmatprep.subr.mxu0 %v2276_v42  ;;  %1863 = vmatprep.subr.mxu1 %v2298_v45 }
 0x34a   : > { %1893 = vmatpush3.msra.mxu0 %v2276_v42  ;;  %1924 = vmatprep.mubr.f32.mxu0 %v1249_v3  ;;  %v2053_v42 = vunpack.i.h.bf16 %v2649_v1 }
 0x34b   : > { %1864 = vmatpush3.msra.mxu1 %v2298_v45  ;;  %1894 = vmatprep.subr.mxu0 %v2281_v43 }
 0x34c   : > { %1865 = vmatprep.subr.mxu1 %v2307_v46  ;;  %1895 = vmatpush3.msra.mxu0 %v2281_v43  ;;  %v2058_v43 = vunpack.i.h.bf16 %v2637_v27 }
 0x34d   : > { %1866 = vmatpush3.msra.mxu1 %v2307_v46  ;;  %1896 = vmatprep.subr.mxu0 %v2289_v44 }
 0x34e   : > { %1867 = vmatprep.subr.mxu1 %v2316_v47  ;;  %1897 = vmatpush3.msra.mxu0 %v2289_v44  ;;  %v1147_v44 = vsel %vm533_vm1, %v2053_v42, %v2058_v43 }
 0x34f   : > { %1868 = vmatpush3.msra.mxu1 %v2316_v47  ;;  %1898 = vmatprep.subr.mxu0 %v2298_v45 }
 0x350   : > { %1869 = vmatprep.subr.mxu1 %v2325_v48  ;;  %1899 = vmatpush3.msra.mxu0 %v2298_v45  ;;  %v2071_v45 = vpop.permute.xlu0 %2070 }
 0x351   : > { %1870 = vmatpush3.msra.mxu1 %v2325_v48  ;;  %1900 = vmatprep.subr.mxu0 %v2307_v46 }
 0x352   : > { %1871 = vmatprep.subr.mxu1 %v2334_v49  ;;  %1901 = vmatpush3.msra.mxu0 %v2307_v46  ;;  %v2068_v46 = vunpack.i.h.bf16 %v2655_v26 }
 0x353   : > { %1872 = vmatpush3.msra.mxu1 %v2334_v49  ;;  %1902 = vmatprep.subr.mxu0 %v2316_v47 }
 0x354   : > { %1873 = vmatprep.subr.mxu1 %v2343_v50  ;;  %1903 = vmatpush3.msra.mxu0 %v2316_v47  ;;  %v1149_v47 = vsel %vm536_vm2, %v1147_v44, %v2250_v38 }
 0x355   : > { %1874 = vmatpush3.msra.mxu1 %v2343_v50  ;;  %1904 = vmatprep.subr.mxu0 %v2325_v48 }
 0x356   : > { %1875 = vmatprep.subr.mxu1 %v2352_v51  ;;  %1905 = vmatpush3.msra.mxu0 %v2325_v48  ;;  %v2073_v48 = vunpack.i.h.bf16 %v2071_v45 }
 0x357   : > { %1876 = vmatpush3.msra.mxu1 %v2352_v51  ;;  %1906 = vmatprep.subr.mxu0 %v2334_v49 }
 0x358   : > { %1877 = vmatprep.subr.mxu1 %v2361_v52  ;;  %1907 = vmatpush3.msra.mxu0 %v2334_v49  ;;  %v2078_v49 = vunpack.i.h.bf16 %v2676_v35 }
 0x359   : > { %1878 = vmatpush3.msra.mxu1 %v2361_v52  ;;  %1908 = vmatprep.subr.mxu0 %v2343_v50 }
 0x35a   : > { %1879 = vmatprep.subr.mxu1 %v2370_v53  ;;  %1909 = vmatpush3.msra.mxu0 %v2343_v50  ;;  %v2072_v50 = vunpack.i.l.bf16 %v2071_v45 }
 0x35b   : > { %1880 = vmatpush3.msra.mxu1 %v2370_v53  ;;  %1910 = vmatprep.subr.mxu0 %v2352_v51 }
 0x35c   : > { %1881 = vmatprep.subr.mxu1 %v2379_v54  ;;  %1911 = vmatpush3.msra.mxu0 %v2352_v51  ;;  %v1151_v51 = vsel %vm539_vm3, %v1149_v47, %v2073_v48  ;;  %v1246_v38 = vsel %vm533_vm1, %v2072_v50, %v2068_v46 }
 0x35d   : > { %1882 = vmatpush3.msra.mxu1 %v2379_v54  ;;  %1912 = vmatprep.subr.mxu0 %v2361_v52 }
 0x35e   : > { %1883 = vmatprep.subr.mxu1 %v2393_v55  ;;  %1913 = vmatpush3.msra.mxu0 %v2361_v52  ;;  %v1248_v52 = vsel %vm536_vm2, %v1246_v38, %v2078_v49 }
 0x35f   : > { %1884 = vmatpush3.msra.mxu1 %v2393_v55  ;;  %1914 = vmatprep.subr.mxu0 %v2370_v53 }
 0x360   : > { %1885 = vmatprep.subr.mxu1 %v2398_v56  ;;  %1915 = vmatpush3.msra.mxu0 %v2370_v53  ;;  %v1250_v53 = vsel %vm539_vm3, %v1248_v52, %v2458_v16 }
 0x361   : > { %1886 = vmatpush3.msra.mxu1 %v2398_v56  ;;  %1916 = vmatprep.subr.mxu0 %v2379_v54 }
 0x362   : > { %1887 = vmatprep.subr.mxu1 %v2410_v57  ;;  %1917 = vmatpush3.msra.mxu0 %v2379_v54  ;;  %v2785_v54 = vld [vmem:[%s2848_s3] ss:$0 sm:$0xff] }
 0x363   : > { %1888 = vmatpush3.msra.mxu1 %v2410_v57  ;;  %1918 = vmatprep.subr.mxu0 %v2393_v55 }
 0x364   : > { %1890 = vmatmul.mubr.f32.vlgmr.msra.gmra.mxu1 %v1151_v51  ;;  %1919 = vmatpush3.msra.mxu0 %v2393_v55 }
 0x365   : > { %1920 = vmatprep.subr.mxu0 %v2398_v56 }
 0x366   : > { %1921 = vmatpush3.msra.mxu0 %v2398_v56 }
 0x367   : > { %1922 = vmatprep.subr.mxu0 %v2410_v57 }
 0x368   : > { %1923 = vmatpush3.msra.mxu0 %v2410_v57 }
 0x369   : > { %1925 = vmatmul.mubr.f32.vlgmr.msra.gmra.mxu0 %v1250_v53 }
 0x3bf   : > { %v1681_v56 = vpop.f32.mrf.mxu1 }
 0x3c0   : > { %v620_v33 = vadd.f32 %v1681_v56, %v2785_v54 }
 0x3c1   : > { %v614_v57 = vpop.f32.mrf.mxu1 }
 0x3c2   : > { %v615_v35 = vadd.f32 %v2785_v54, %v614_v57 }
 0x3c4   : > { %v1716_v55 = vpop.f32.mrf.mxu0 }
 0x3c5   : > { %v721_v4 = vadd.f32 %v1716_v55, %v2785_v54 }
 0x3c6   : > { %v715_v9 = vpop.f32.mrf.mxu0 }
 0x3c7   : > { %v716_v36 = vadd.f32 %v2785_v54, %v715_v9  ;;  %1330 = vrot.lane.b32.xlu1 %v721_v4, %s2104_s12 }
 0x3c9   : > { %1328 = vrot.lane.b32.xlu0 %v716_v36, %s2104_s12 }
 0x3e0   : > { %v1751_v10 = vpop.f32.mrf.mxu1 }
 0x3e1   : > { %v820_v16 = vadd.f32 %v1751_v10, %v2785_v54 }
 0x3e2   : > { %v814_v6 = vpop.f32.mrf.mxu1 }
 0x3e3   : > { %v815_v11 = vadd.f32 %v2785_v54, %v814_v6  ;;  %1338 = vrot.lane.b32.xlu1 %v820_v16, %s2105_s13 }
 0x3e5   : > { %1336 = vrot.lane.b32.xlu0 %v815_v11, %s2105_s13 }
 0x3e6   : > { %v1786_v7 = vpop.f32.mrf.mxu0 }
 0x3e7   : > { %v919_v12 = vadd.f32 %v1786_v7, %v2785_v54 }
 0x3e8   : > { %v913_v22 = vpop.f32.mrf.mxu0 }
 0x3e9   : > { %v914_v21 = vadd.f32 %v2785_v54, %v913_v22  ;;  %1346 = vrot.lane.b32.xlu1 %v919_v12, %s2106_s10 }
 0x3eb   : > { %1344 = vrot.lane.b32.xlu0 %v914_v21, %s2106_s10 }
 0x402   : > { %v1821_v19 = vpop.f32.mrf.mxu1 }
 0x403   : > { %v1024_v63 = vadd.f32 %v1821_v19, %v2785_v54 }
 0x404   : > { %v1018_v17 = vpop.f32.mrf.mxu1 }
 0x405   : > { %v1019_v0 = vadd.f32 %v2785_v54, %v1018_v17 }
 0x408   : > { %v1856_v13 = vpop.f32.mrf.mxu0 }
 0x409   : > { %v1125_v14 = vadd.f32 %v1856_v13, %v2785_v54 }
 0x40a   : > { %v1119_v15 = vpop.f32.mrf.mxu0 }
 0x40b   : > { %v1120_v18 = vadd.f32 %v2785_v54, %v1119_v15  ;;  %1354 = vrot.lane.b32.xlu1 %v1125_v14, %s2104_s12 }
 0x40d   : > { %1352 = vrot.lane.b32.xlu0 %v1120_v18, %s2104_s12  ;;  %s217_s12 = scalar_lea.vmem [#allocation3], %s2175_s6  ;;  %s1502_s6 = sshll.u32 (%p2162_p5), %s1479_s18, 4 }
 0x40e   : > { %s1399_s20 = scalar_lea.vmem (%p2162_p5), %s2849_s4, %s1502_s6 }
 0x424   : > { %v1891_v20 = vpop.f32.mrf.mxu1 }
 0x425   : > { %v1224_v27 = vadd.f32 %v1891_v20, %v2785_v54 }
 0x426   : > { %v1218_v1 = vpop.f32.mrf.mxu1 }
 0x427   : > { %v1219_v23 = vadd.f32 %v2785_v54, %v1218_v1  ;;  %1362 = vrot.lane.b32.xlu1 %v1224_v27, %s2105_s13 }
 0x429   : > { %v1926_v24 = vpop.f32.mrf.mxu0  ;;  %1360 = vrot.lane.b32.xlu0 %v1219_v23, %s2105_s13 }
 0x42a   : > { %v1323_v26 = vadd.f32 %v1926_v24, %v2785_v54 }
 0x42b   : > { %v1317_v28 = vpop.f32.mrf.mxu0 }
 0x42c   : > { %v1318_v34 = vadd.f32 %v2785_v54, %v1317_v28  ;;  %1370 = vrot.lane.b32.xlu1 %v1323_v26, %s2106_s10 }
 0x42e   : > { %1368 = vrot.lane.b32.xlu0 %v1318_v34, %s2106_s10 }
 0x439   : > { %v1331_v29 = vpop.permute.xlu1 %1330 }
 0x43a   : > { %v1375_v37 = vsel %vm533_vm1, %v620_v33, %v1331_v29 }
 0x43b   : > { %v1329_v30 = vpop.permute.xlu0 %1328 }
 0x43c   : > { %v1374_v5 = vsel %vm533_vm1, %v615_v35, %v1329_v30 }
 0x455   : > { %v1339_v31 = vpop.permute.xlu1 %1338 }
 0x456   : > { %v1377_v61 = vsel %vm536_vm2, %v1375_v37, %v1339_v31 }
 0x457   : > { %v1337_v32 = vpop.permute.xlu0 %1336 }
 0x458   : > { %v1376_v58 = vsel %vm536_vm2, %v1374_v5, %v1337_v32 }
 0x45b   : > { %v1347_v39 = vpop.permute.xlu1 %1346 }
 0x45c   : > { %v1379_v41 = vsel %vm539_vm3, %v1377_v61, %v1347_v39 }
 0x45d   : > { %1388 = vst [vmem:[%s217_s12 + $0x10] sm:$0xff] %v1379_v41  ;;  %v1345_v59 = vpop.permute.xlu0 %1344 }
 0x45e   : > { %v1378_v60 = vsel %vm539_vm3, %v1376_v58, %v1345_v59 }
 0x45f   : > { %1386 = vst [vmem:[%s217_s12] sm:$0xff] %v1378_v60 }
 0x464   : > { %v1416_v50 = vld [vmem:[%s217_s12 + $0x10] sm:$0xff] (%p2162_p5) }
 0x465   : > { %1417 = vst [vmem:[%s1399_s20 + $0x20] sm:$0xff] (%p2162_p5), %v1416_v50 }
 0x466   : > { %v1412_v48 = vld [vmem:[%s217_s12] sm:$0xff] (%p2162_p5) }
 0x467   : > { %1413 = vst [vmem:[%s1399_s20] sm:$0xff] (%p2162_p5), %v1412_v48 }
 0x47d   : > { %v1355_v40 = vpop.permute.xlu1 %1354 }
 0x47e   : > { %v1381_v2 = vsel %vm533_vm1, %v1024_v63, %v1355_v40 }
 0x47f   : > { %v1353_v62 = vpop.permute.xlu0 %1352 }
 0x480   : > { %v1380_v43 = vsel %vm533_vm1, %v1019_v0, %v1353_v62 }
 0x499   : > { %v1363_v8 = vpop.permute.xlu1 %1362 }
 0x49a   : > { %v1383_v3 = vsel %vm536_vm2, %v1381_v2, %v1363_v8 }
 0x49b   : > { %v1361_v25 = vpop.permute.xlu0 %1360 }
 0x49c   : > { %v1382_v45 = vsel %vm536_vm2, %v1380_v43, %v1361_v25 }
 0x49e   : > { %v1371_v42 = vpop.permute.xlu1 %1370  ;;  %1396 = sbr.rel (!%p2162_p5) target bundleno = 1195 (0x4ab), region = 63 }
 0x49f   : > { %v1385_v44 = vsel %vm539_vm3, %v1383_v3, %v1371_v42 }
 0x4a0   : > { %1389 = vst [vmem:[%s217_s12 + $0x18] sm:$0xff] %v1385_v44  ;;  %v1369_v46 = vpop.permute.xlu0 %1368 }
 0x4a1   : > { %v1384_v47 = vsel %vm539_vm3, %v1382_v45, %v1369_v46 }
 0x4a2   : > { %1387 = vst [vmem:[%s217_s12 + $0x8] sm:$0xff] %v1384_v47 }
 0x4a7   : > { %v1418_v51 = vld [vmem:[%s217_s12 + $0x18] sm:$0xff] }
 0x4a8   : > { %1419 = vst [vmem:[%s1399_s20 + $0x28] sm:$0xff] %v1418_v51 }
 0x4a9   : > { %v1414_v49 = vld [vmem:[%s217_s12 + $0x8] sm:$0xff] }
 0x4aa   : > { %1415 = vst [vmem:[%s1399_s20 + $0x8] sm:$0xff] %v1414_v49 }
 0x4ab PF: > { %p11_p10 = scmp.ge.s32.totalorder %s2149_s19, 4   ;;  %s2851_s15 = smov %s2097_s16 }
 0x4ac   : > { %s2852_s16 = smov %s2160_s22  ;;  %s2853_s17 = smov %s2149_s19 }
 0x4ad   :  { %13 = sbr.rel (!%p11_p10) target bundleno = 2 (0x2), region = 117 }

</bundles_post_ra>
